<compile_context>
chip_gen: v5e
topology: v5e:2x2
jax: 0.10.0
libtpu: 0.0.40
codegen_flags: <defaults>
</compile_context>

<pallas_src>
import functools
import math

import jax
import jax.numpy as jnp
from jax import lax
from jax.experimental import pallas as pl
from jax.experimental.pallas import tpu as pltpu


def _round_up(v, m):
    return (v + m - 1) // m * m


def _logit_head_kernel(scale_ref, x_ref, w_ref, o_ref, xn_ref, *, eps):
    """Computes one (TB, TC) output tile: TB rows of x against TC rows of W."""
    # Per-row factor exp(logit_scale) / max(||x||_2, eps) and the row scaling are
    # computed once per batch tile (class-tile axis j is innermost/"arbitrary")
    # and cached in VMEM scratch for reuse across all class tiles.
    @pl.when(pl.program_id(1) == 0)
    def _():
        x_f32 = x_ref[...].astype(jnp.float32)                        # (TB, D)
        # rsqrt(max(sq, eps^2)) == 1 / max(sqrt(sq), eps) (sqrt is monotone);
        # all-zero rows stay exactly zero after the multiply.
        sq = jnp.sum(x_f32 * x_f32, axis=1, keepdims=True)            # (TB, 1)
        f = scale_ref[0, 0] * lax.rsqrt(jnp.maximum(sq, eps * eps))   # (TB, 1)
        # Cast back to the operand dtype for the MXU (bf16 stays bf16).
        xn_ref[...] = (x_f32 * f).astype(xn_ref.dtype)

    # (TB, D) x (TC, D) -> (TB, TC): contract on D (i.e. x @ W.T), f32 accumulate.
    logits = lax.dot_general(
        xn_ref[...], w_ref[...],
        dimension_numbers=(((1,), (1,)), ((), ())),
        preferred_element_type=jnp.float32)
    o_ref[...] = logits.astype(o_ref.dtype)


def logit_head(x, weight, logit_scale=None, eps=1e-12):
    """x: (B, in_features); weight: (num_classes, in_features) as in nn.Linear.

    logit_scale: runtime scalar (python float or jnp scalar); default log(1/0.07).
    Returns (B, num_classes) in x.dtype.
    """
    if logit_scale is None:
        logit_scale = math.log(1.0 / 0.07)

    B, D = x.shape
    C, D2 = weight.shape
    assert D == D2, (D, D2)

    # exp() of the (possibly learnable) runtime scalar, shipped to SMEM as (1,1).
    scale = jnp.exp(jnp.asarray(logit_scale, dtype=jnp.float32)).reshape(1, 1)

    # Tile sizes: lane-dense output (TC multiple of 128), sublane-aligned batch.
    TB = 128 if B > 128 else _round_up(B, 8)
    TC = 512 if C > 512 else _round_up(C, 128)
    B_pad = _round_up(B, TB)
    C_pad = _round_up(C, TC)

    x_p = x if B_pad == B else jnp.pad(x, ((0, B_pad - B), (0, 0)))
    w_p = weight if C_pad == C else jnp.pad(weight, ((0, C_pad - C), (0, 0)))

    # TODO(synk): for very large D (>~8K) add a K grid axis with a VMEM f32
    # accumulator + pl.when init/finalize (carrying the sum-of-squares in
    # scratch) so blocks fit v7x's 64 MiB VMEM; here D is kept whole per block.

    itemsize = max(jnp.dtype(x.dtype).itemsize, jnp.dtype(weight.dtype).itemsize)
    # Double-buffered input/output tiles + the single-buffered xn scratch.
    est_bytes = (2 * (TB * D + TC * D + TB * TC) + TB * D) * itemsize
    vmem_limit = int(min(max(4 * est_bytes, 32 * 1024 * 1024), 64 * 1024 * 1024))

    kernel = functools.partial(_logit_head_kernel, eps=eps)

    out = pl.pallas_call(
        kernel,
        out_shape=jax.ShapeDtypeStruct((B_pad, C_pad), x.dtype),
        grid_spec=pltpu.PrefetchScalarGridSpec(
            num_scalar_prefetch=0,
            grid=(B_pad // TB, C_pad // TC),
            in_specs=[
                pl.BlockSpec(memory_space=pltpu.MemorySpace.SMEM),   # scale (1,1)
                pl.BlockSpec((TB, D), lambda i, j: (i, 0)),          # x row tile
                pl.BlockSpec((TC, D), lambda i, j: (j, 0)),          # W class tile
            ],
            out_specs=pl.BlockSpec((TB, TC), lambda i, j: (i, j)),
            scratch_shapes=[pltpu.VMEM((TB, D), x.dtype)],           # cached xn
        ),
        compiler_params=pltpu.CompilerParams(
            # j carries the cached-xn scratch -> "arbitrary"; i stays "parallel"
            # so v7x shards batch tiles across both TensorCores.
            dimension_semantics=("parallel", "arbitrary"),
            vmem_limit_bytes=vmem_limit,
        ),
        cost_estimate=pl.CostEstimate(
            flops=2 * B_pad * C_pad * D + 3 * B_pad * D,
            transcendentals=B_pad,
            bytes_accessed=(B_pad * D + C_pad * D + B_pad * C_pad) * itemsize,
        ),
    )(scale, x_p, w_p)

    if B_pad != B or C_pad != C:
        out = out[:B, :C]
    return out


if __name__ == "__main__":
    key = jax.random.PRNGKey(0)
    kx, kw = jax.random.split(key)

    batch = 8
    in_features = 32
    num_classes = 16

    x = jax.random.normal(kx, (batch, in_features), dtype=jnp.float32)
    # Deterministic synthetic weight, shaped like nn.Linear: (num_classes, in_features)
    weight = jax.random.normal(kw, (num_classes, in_features), dtype=jnp.float32) * 0.02
    logit_scale = jnp.float32(math.log(1.0 / 0.07))

    out = logit_head(x, weight, logit_scale)
    out = jax.block_until_ready(out)

    # Reference check in plain JAX (same math as the PyTorch module).
    xn = x / jnp.maximum(jnp.sqrt(jnp.sum(x * x, axis=1, keepdims=True)), 1e-12)
    ref = (xn @ weight.T) * jnp.exp(logit_scale)
    assert out.shape == (batch, num_classes)
    assert jnp.allclose(out, ref, atol=1e-4, rtol=1e-4), "mismatch vs reference"

    print("KERNEL_OK")
</pallas_src>

<mosaic_0001>
module attributes {stable_mosaic.version = 11 : i64} {
  func.func @_logit_head_kernel(%arg0: i32, %arg1: i32, %arg2: memref<1x1xf32, #tpu.memory_space<smem>>, %arg3: memref<8x32xf32, #tpu.memory_space<vmem>>, %arg4: memref<128x32xf32, #tpu.memory_space<vmem>>, %arg5: memref<8x128xf32, #tpu.memory_space<vmem>>, %arg6: memref<8x32xf32, #tpu.memory_space<vmem>>) attributes {dimension_semantics = [#tpu.dimension_semantics<parallel>, #tpu.dimension_semantics<arbitrary>], iteration_bounds = array<i64: 1, 1>, scalar_prefetch = 0 : i64, scratch_operands = 1 : i64, tpu.core_type = #tpu.core_type<tc>, window_params = [{transform_indices = @transform_0, window_bounds = array<i64: 1, 1>}, {transform_indices = @transform_1, window_bounds = array<i64: 8, 32>}, {transform_indices = @transform_2, window_bounds = array<i64: 128, 32>}, {transform_indices = @transform_3, window_bounds = array<i64: 8, 128>}]} {
    %c0_i32 = arith.constant 0 : i32
    %0 = arith.cmpi eq, %arg1, %c0_i32 : i32
    %1 = arith.extui %0 : i1 to i32
    %c0_i32_0 = arith.constant 0 : i32
    %2 = arith.cmpi ne, %1, %c0_i32_0 : i32
    scf.if %2 {
      %c0_6 = arith.constant 0 : index
      %c0_7 = arith.constant 0 : index
      %7 = vector.load %arg3[%c0_6, %c0_7] : memref<8x32xf32, #tpu.memory_space<vmem>>, vector<8x32xf32>
      %8 = arith.mulf %7, %7 : vector<8x32xf32>
      %cst_8 = arith.constant dense<0.000000e+00> : vector<8xf32>
      %9 = vector.multi_reduction <add>, %8, %cst_8 [1] : vector<8x32xf32> to vector<8xf32>
      %10 = vector.shape_cast %9 : vector<8xf32> to vector<8x1xf32>
      %c0_9 = arith.constant 0 : index
      %c0_10 = arith.constant 0 : index
      %11 = memref.load %arg2[%c0_9, %c0_10] : memref<1x1xf32, #tpu.memory_space<smem>>
      %cst_11 = arith.constant 1.000000e-24 : f32
      %12 = vector.broadcast %cst_11 : f32 to vector<8x1xf32>
      %13 = arith.maximumf %10, %12 : vector<8x1xf32>
      %14 = math.rsqrt %13 : vector<8x1xf32>
      %15 = vector.broadcast %11 : f32 to vector<8x1xf32>
      %16 = arith.mulf %15, %14 : vector<8x1xf32>
      %17 = vector.broadcast %16 : vector<8x1xf32> to vector<8x32xf32>
      %18 = arith.mulf %7, %17 : vector<8x32xf32>
      %c0_12 = arith.constant 0 : index
      %c0_13 = arith.constant 0 : index
      %19 = vector.load %arg6[%c0_12, %c0_13] : memref<8x32xf32, #tpu.memory_space<vmem>>, vector<8x32xf32>
      tpu.vector_store %arg6[%c0_12, %c0_13], %18 {strides = array<i32>} : memref<8x32xf32, #tpu.memory_space<vmem>>, vector<8x32xf32>,
    } else {
    }
    %c0 = arith.constant 0 : index
    %c0_1 = arith.constant 0 : index
    %3 = vector.load %arg6[%c0, %c0_1] : memref<8x32xf32, #tpu.memory_space<vmem>>, vector<8x32xf32>
    %c0_2 = arith.constant 0 : index
    %c0_3 = arith.constant 0 : index
    %4 = vector.load %arg4[%c0_2, %c0_3] : memref<128x32xf32, #tpu.memory_space<vmem>>, vector<128x32xf32>
    %cst = arith.constant dense<0.000000e+00> : vector<8x128xf32>
    %5 = tpu.matmul %3, %4, %cst {dimension_numbers = #tpu.dot_dimension_numbers<[1], [1], [0], [0], [0, 0, 1, 0], [], []>} : vector<8x32xf32>, vector<128x32xf32>, vector<8x128xf32> -> vector<8x128xf32>
    %c0_4 = arith.constant 0 : index
    %c0_5 = arith.constant 0 : index
    %6 = vector.load %arg5[%c0_4, %c0_5] : memref<8x128xf32, #tpu.memory_space<vmem>>, vector<8x128xf32>
    tpu.vector_store %arg5[%c0_4, %c0_5], %5 {strides = array<i32>} : memref<8x128xf32, #tpu.memory_space<vmem>>, vector<8x128xf32>,
    return
  }
  func.func @transform_0(%arg0: i32, %arg1: i32) -> (i32, i32) {
    %c0_i32 = arith.constant 0 : i32
    %c0_i32_0 = arith.constant 0 : i32
    %c0_i32_1 = arith.constant 0 : i32
    return %c0_i32, %c0_i32_0 : i32, i32
  }
  func.func @transform_1(%arg0: i32, %arg1: i32) -> (i32, i32) {
    %c0_i32 = arith.constant 0 : i32
    %c0_i32_0 = arith.constant 0 : i32
    return %arg0, %c0_i32 : i32, i32
  }
  func.func @transform_2(%arg0: i32, %arg1: i32) -> (i32, i32) {
    %c0_i32 = arith.constant 0 : i32
    %c0_i32_0 = arith.constant 0 : i32
    return %arg1, %c0_i32 : i32, i32
  }
  func.func @transform_3(%arg0: i32, %arg1: i32) -> (i32, i32) {
    %c0_i32 = arith.constant 0 : i32
    return %arg0, %arg1 : i32, i32
  }
}

</mosaic_0001>

<bundles_post_ra>
// kernel: tpu_custom_call.1
= control target key start
LH: loop header
LB: loop body
LE: loop exit
PB: predicated region body
PF: predicated region fallthrough
CT: control target
= control target key end

     0   :  { %vm22_vm0 = vcmask 261120   ;;  %s291_s0 = inlined_call_operand.<no memory space> [shape: f32[1,1], index: 0, kind: input, shape index: {}]   ;;  %s292_s1 = inlined_call_operand.vmem [shape: f32[8,32], index: 1, kind: input, shape index: {}]   ;;  %s293_s2 = inlined_call_operand.vmem [shape: f32[128,32], index: 2, kind: input, shape index: {}]   ;;  %s294_s3 = inlined_call_operand.hbm [shape: f32[8,128], index: 3, kind: output, shape index: {}]  }
   0x1   :  { %v20_v0 = vld [vmem:[%s292_s1] sm:$0xff]  ;;  %v58_v1 = vld [vmem:[%s293_s2 + $0x78] sm:$0xff]  ;;  %v57_v3 = vld [vmem:[%s293_s2 + $0x70] sm:$0xff] }
   0x2   :  { %v21_v2 = vmul.f32 %v20_v0, %v20_v0  ;;  %148 = vmatpush.xpose.msk.msra.mxu0 %vm22_vm0, %v58_v1 }
   0x4   :  { %v23_v4 = vsel %vm22_vm0, %v21_v2, 0.0 }
   0x5   :  { %9 = vsyncpa [#allocation5], 0  ;;  %24 = vadd.xlane.f32.xlu0 %v23_v4  ;;  %v56_v5 = vld [vmem:[%s293_s2 + $0x68] sm:$0xff]  ;;  %v55_v6 = vld [vmem:[%s293_s2 + $0x60] sm:$0xff]  ;;  %v38_v27 = vstv %s291_s0  ;;  %s139_s22 = sshll.u32 %s294_s3, 4  ;;  %s140_s22 = int_to_ptr.hbm [resolvable:$true] %s139_s22 }
   0x6   :  { %149 = vmatpush.xpose.msk.msra.mxu0 %vm22_vm0, %v57_v3  ;;  %v54_v7 = vld [vmem:[%s293_s2 + $0x58] sm:$0xff]  ;;  %v53_v8 = vld [vmem:[%s293_s2 + $0x50] sm:$0xff]  ;;  %v52_v9 = vld [vmem:[%s293_s2 + $0x48] sm:$0xff] }
   0x7   :  { %v51_v10 = vld [vmem:[%s293_s2 + $0x40] sm:$0xff]  ;;  %v50_v11 = vld [vmem:[%s293_s2 + $0x38] sm:$0xff]  ;;  %v49_v12 = vld [vmem:[%s293_s2 + $0x30] sm:$0xff] }
   0x8   :  { %v48_v13 = vld [vmem:[%s293_s2 + $0x28] sm:$0xff]  ;;  %v47_v14 = vld [vmem:[%s293_s2 + $0x20] sm:$0xff]  ;;  %v46_v15 = vld [vmem:[%s293_s2 + $0x18] sm:$0xff] }
   0x9   :  { %v45_v16 = vld [vmem:[%s293_s2 + $0x10] sm:$0xff]  ;;  %v44_v17 = vld [vmem:[%s293_s2 + $0x8] sm:$0xff]  ;;  %v43_v18 = vld [vmem:[%s293_s2] sm:$0xff]  ;;  %s194_s2 = smov [#allocation4]  }
   0xa   :  { %150 = vmatpush.xpose.msk.msra.mxu0 %vm22_vm0, %v56_v5  ;;  %s137_s19 = sshll.u32 %s194_s2, 4  ;;  %s138_s19 = int_to_ptr.vmem [resolvable:$true] %s137_s19 }
   0xe   :  { %151 = vmatpush.xpose.msk.msra.mxu0 %vm22_vm0, %v55_v6 }
  0x12   :  { %152 = vmatpush.xpose.msk.msra.mxu0 %vm22_vm0, %v54_v7 }
  0x16   :  { %153 = vmatpush.xpose.msk.msra.mxu0 %vm22_vm0, %v53_v8 }
  0x1a   :  { %154 = vmatpush.xpose.msk.msra.mxu0 %vm22_vm0, %v52_v9 }
  0x1e   :  { %155 = vmatpush.xpose.msk.msra.mxu0 %vm22_vm0, %v51_v10 }
  0x22   :  { %156 = vmatpush.xpose.msk.msra.mxu0 %vm22_vm0, %v50_v11 }
  0x26   :  { %157 = vmatpush.xpose.msk.msra.mxu0 %vm22_vm0, %v49_v12 }
  0x2a   :  { %158 = vmatpush.xpose.msk.msra.mxu0 %vm22_vm0, %v48_v13 }
  0x2e   :  { %159 = vmatpush.xpose.msk.msra.mxu0 %vm22_vm0, %v47_v14 }
  0x32   :  { %160 = vmatpush.xpose.msk.msra.mxu0 %vm22_vm0, %v46_v15 }
  0x36   :  { %161 = vmatpush.xpose.msk.msra.mxu0 %vm22_vm0, %v45_v16 }
  0x3a   :  { %162 = vmatpush.xpose.msk.msra.mxu0 %vm22_vm0, %v44_v17 }
  0x3e   :  { %163 = vmatpush.xpose.msk.msra.mxu0 %vm22_vm0, %v43_v18 }
  0x78   :  { %v25_v19 = vpop.xlane.xlu0 %24 }
  0x79   :  { %v27_v20 = vmax.f32 %v25_v19, 1e-24 }
  0x7b   :  { %166 = vrsqrt.f32 %v27_v20  ;;  %vm34_vm2 = vweird.f32 %v27_v20 }
  0x81   :  { %v167_v21 = vpop.eup %166 }
  0x82   :  { %v29_v22 = vmul.f32 %v167_v21, %v27_v20  ;;  %vm35_vm1 = vweird.f32 %v167_v21 }
  0x83   :  { %vm36_vm3 = vmor %vm34_vm2, %vm35_vm1 }
  0x84   :  { %v30_v23 = vmul.f32 %v167_v21, %v29_v22 }
  0x86   :  { %v31_v24 = vmul.f32 0.5, %v30_v23 }
  0x88   :  { %v32_v25 = vsub.f32 1.5, %v31_v24 }
  0x8a   :  { %v33_v26 = vmul.f32 %v167_v21, %v32_v25 }
  0x8c   :  { %v37_v28 = vsel %vm36_vm3, %v167_v21, %v33_v26 }
  0x8d   :  { %v39_v29 = vmul.f32 %v38_v27, %v37_v28 }
  0x8f   :  { %v40_v30 = vmul.f32 %v39_v29, %v20_v0 }
  0x91   :  { %41 = vst.msk [vmem:[#allocation2] sm:$0xff] %vm22_vm0, %v40_v30 }
  0x98   :  { %v42_v31 = vld [vmem:[#allocation2] sm:$0xff] }
  0x99   :  { %164 = vmatmul.msk.f32.vlgmr.msra.gmra.mxu0 %vm22_vm0, %v42_v31 }
 0x116   :  { %v128_v32 = vpop.f32.mrf.mxu0 }
 0x117   :  { %131 = vst [vmem:[#allocation4] sm:$0xff] %v128_v32 }
 0x118   :  { %142 = dma.vmem_to_hbm [thread:$0]  %s138_s19, 128, %s140_s22, [#allocation5]  }
 0x119   :  { %192 = dma.done.wait [#allocation5], 128  }
 0x11a   :  { %193 = vsyncadd [#allocation5], 4294967168 }
 0x11b   :  { %147 = vsyncpa [#allocation5], 1 }

</bundles_post_ra>
